<compile_context>
chip_gen: v5e
topology: v5e:2x2
jax: 0.10.0
libtpu: 0.0.40
codegen_flags: <defaults>
</compile_context>

<pallas_src>
import jax
import jax.numpy as jnp
from jax.experimental import pallas as pl
from jax.experimental.pallas import tpu as pltpu

_LANE = 128
_MIB = 1 << 20
# Resident-weight budget before switching to the K-tiled streaming path
# (conservative for v7x: 64 MiB/TC minus tiles/accumulators/headroom).
_RESIDENT_WEIGHT_BUDGET = 24 * _MIB


def _round_up(x, m):
    return (x + m - 1) // m * m


# ---------------------------------------------------------------------------
# Kernels
# ---------------------------------------------------------------------------

def _mlp_kernel_resident(x_ref, w1_ref, b1_ref, w2_ref, b2_ref, w3_ref, b3_ref,
                         o_ref):
    """All weights VMEM-resident; one (TB, in_p) batch tile per grid step."""
    x = x_ref[...].astype(w1_ref.dtype)  # cast activation stream in-kernel

    h1 = jnp.dot(x, w1_ref[...], preferred_element_type=jnp.float32) + b1_ref[...]
    h1 = jnp.maximum(h1.astype(w2_ref.dtype), 0)  # ReLU in bf16 (cast is monotone)

    h2 = jnp.dot(h1, w2_ref[...], preferred_element_type=jnp.float32) + b2_ref[...]
    h2 = jnp.maximum(h2.astype(w3_ref.dtype), 0)

    out = jnp.dot(h2, w3_ref[...], preferred_element_type=jnp.float32) + b3_ref[...]
    o_ref[...] = out.astype(o_ref.dtype)


def _mlp_kernel_ktiled(x_ref, w1_ref, b1_ref, w2_ref, b2_ref, w3_ref, b3_ref,
                       o_ref, acc_ref):
    """Large-hidden fallback: grid = (batch_tiles, hid_tiles).

    The hidden dim is both N of matmul-1 and K of matmul-2: w1/w2 stream in
    hid-tiles while a (TB, hid_p) f32 accumulator holds matmul-2 partial sums.
    """
    k = pl.program_id(1)

    @pl.when(k == 0)
    def _():
        acc_ref[...] = jnp.zeros_like(acc_ref)

    x = x_ref[...].astype(w1_ref.dtype)
    h1 = jnp.dot(x, w1_ref[...], preferred_element_type=jnp.float32) + b1_ref[...]
    h1 = jnp.maximum(h1.astype(w2_ref.dtype), 0)
    acc_ref[...] += jnp.dot(h1, w2_ref[...], preferred_element_type=jnp.float32)

    @pl.when(k == pl.num_programs(1) - 1)
    def _():
        h2 = jnp.maximum((acc_ref[...] + b2_ref[...]).astype(w3_ref.dtype), 0)
        out = jnp.dot(h2, w3_ref[...], preferred_element_type=jnp.float32) + b3_ref[...]
        o_ref[...] = out.astype(o_ref.dtype)


# ---------------------------------------------------------------------------
# Parameter preparation (run ONCE, outside the per-call path)
# ---------------------------------------------------------------------------

def prepare_params(params, *, compute_dtype=jnp.bfloat16):
    """Pad weights to lane-dense multiples of 128 and cast to the compute dtype.

    Padded rows/cols and padded biases are zero, so padded lanes stay exactly
    zero through bias + ReLU and the real outputs are unaffected.
    """
    w1, b1, w2, b2, w3, b3 = params
    in_dim, hidden_dim = w1.shape
    out_dim = w3.shape[1]
    in_p = _round_up(in_dim, _LANE)
    hid_p = _round_up(hidden_dim, _LANE)
    out_p = _round_up(out_dim, _LANE)
    cd = compute_dtype

    def pad_w(w, rows, cols):
        return jnp.zeros((rows, cols), cd).at[: w.shape[0], : w.shape[1]].set(
            w.astype(cd))

    def pad_b(b, cols):
        b = jnp.reshape(b, (1, -1)).astype(jnp.float32)  # biases stay f32
        return jnp.zeros((1, cols), jnp.float32).at[:, : b.shape[1]].set(b)

    return dict(
        w1=pad_w(w1, in_p, hid_p), b1=pad_b(b1, hid_p),
        w2=pad_w(w2, hid_p, hid_p), b2=pad_b(b2, hid_p),
        w3=pad_w(w3, hid_p, out_p), b3=pad_b(b3, out_p),
        dims=(in_dim, hidden_dim, out_dim),
        padded_dims=(in_p, hid_p, out_p),
    )


# ---------------------------------------------------------------------------
# Tiling heuristics
# ---------------------------------------------------------------------------

def _pick_batch_tile(batch, sub, max_tb):
    """Largest sublane-aligned tile (<= max_tb) keeping batch padding <= ~12.5%."""
    b_min = _round_up(batch, sub)
    cand = min(_round_up(max_tb, sub), b_min)
    while cand > sub:
        b_pad = _round_up(batch, cand)
        if 8 * (b_pad - batch) <= b_pad:  # padded rows <= 12.5 %
            return cand, b_pad
        cand = max(sub, _round_up(cand // 2, sub))
    return sub, b_min


def _pick_hid_tile(hid_p, max_tk):
    """Largest multiple of 128 that divides hid_p and is <= max_tk (>= 128)."""
    n_blocks = hid_p // _LANE
    best = 1
    for nb in range(1, n_blocks + 1):
        if n_blocks % nb == 0 and nb * _LANE <= max(max_tk, _LANE):
            best = nb
    return best * _LANE


# ---------------------------------------------------------------------------
# Forward
# ---------------------------------------------------------------------------

def mlp_forward(x_nchw, prepared, *, block_b=512, out_dtype=jnp.float32,
                force_ktiled=False, hid_tile=512):
    """x_nchw: (B, C, H, W) (anything reshaping to (B, in_dim)). -> (B, out_dim)."""
    in_dim, hidden_dim, out_dim = prepared["dims"]
    in_p, hid_p, out_p = prepared["padded_dims"]
    w1p, b1p = prepared["w1"], prepared["b1"]
    w2p, b2p = prepared["w2"], prepared["b2"]
    w3p, b3p = prepared["w3"], prepared["b3"]

    x = jnp.reshape(x_nchw, (-1, in_dim))  # == input.view(-1, in_dim)
    batch = x.shape[0]
    x_itemsize = jnp.dtype(x.dtype).itemsize
    sub = 8 if x_itemsize >= 4 else 16  # sublane granularity of the x tile

    tb, b_p = _pick_batch_tile(batch, sub, block_b)
    if b_p != batch or in_p != in_dim:  # pad only when actually needed
        x = jnp.pad(x, ((0, b_p - batch), (0, in_p - in_dim)))

    w_itemsize = jnp.dtype(w1p.dtype).itemsize
    weight_bytes = int((w1p.size + w2p.size + w3p.size) * w_itemsize)
    bias_bytes = int((b1p.size + b2p.size + b3p.size) * 4)
    out_itemsize = jnp.dtype(out_dtype).itemsize
    stream_bytes = tb * in_p * x_itemsize + tb * out_p * out_itemsize

    use_ktiled = force_ktiled or weight_bytes > _RESIDENT_WEIGHT_BUDGET

    cost = pl.CostEstimate(
        flops=2 * b_p * (in_p * hid_p + hid_p * hid_p + hid_p * out_p),
        transcendentals=0,
        bytes_accessed=int(b_p * in_p * x_itemsize + weight_bytes + bias_bytes
                           + b_p * out_p * out_itemsize),
    )
    out_shape = jax.ShapeDtypeStruct((b_p, out_p), out_dtype)

    def build_call(single_buffer_consts):
        cmode = ({"pipeline_mode": pl.Buffered(1)} if single_buffer_consts else {})
        wbuf = 1 if single_buffer_consts else 2

        if not use_ktiled:
            const = lambda shape: pl.BlockSpec(shape, lambda i: (0, 0), **cmode)
            grid = (b_p // tb,)
            in_specs = [
                pl.BlockSpec((tb, in_p), lambda i: (i, 0)),
                const(w1p.shape), const(b1p.shape),
                const(w2p.shape), const(b2p.shape),
                const(w3p.shape), const(b3p.shape),
            ]
            out_specs = pl.BlockSpec((tb, out_p), lambda i: (i, 0))
            scratch = ()
            dim_sem = ("parallel",)
            kernel = _mlp_kernel_resident
            vmem_need = (wbuf * (weight_bytes + bias_bytes) + 2 * stream_bytes
                         + 3 * tb * hid_p * 4)
        else:
            tk = _pick_hid_tile(hid_p, hid_tile)
            const = lambda shape: pl.BlockSpec(shape, lambda i, k: (0, 0), **cmode)
            grid = (b_p // tb, hid_p // tk)
            in_specs = [
                pl.BlockSpec((tb, in_p), lambda i, k: (i, 0)),    # x (resident over k)
                pl.BlockSpec((in_p, tk), lambda i, k: (0, k)),    # w1 hid-tile (N)
                pl.BlockSpec((1, tk), lambda i, k: (0, k)),       # b1 hid-tile
                pl.BlockSpec((tk, hid_p), lambda i, k: (k, 0)),   # w2 hid-tile (K)
                const(b2p.shape),
                const(w3p.shape),
                const(b3p.shape),
            ]
            out_specs = pl.BlockSpec((tb, out_p), lambda i, k: (i, 0))
            scratch = (pltpu.VMEM((tb, hid_p), jnp.float32),)
            dim_sem = ("parallel", "arbitrary")
            kernel = _mlp_kernel_ktiled
            streamed_w = 2 * (in_p * tk + tk * hid_p + tk) * w_itemsize
            vmem_need = (wbuf * (w3p.size * w_itemsize + bias_bytes)
                         + 2 * stream_bytes + streamed_w
                         + tb * hid_p * 4          # f32 accumulator scratch
                         + tb * hid_p * 4          # matmul-2 partial product
                         + 3 * tb * tk * 4)        # h1 intermediates

        vmem_limit = max(32 * _MIB, min(int(vmem_need * 1.25), 128 * _MIB))

        return pl.pallas_call(
            kernel,
            out_shape=out_shape,
            grid=grid,
            in_specs=in_specs,
            out_specs=out_specs,
            scratch_shapes=scratch,
            compiler_params=pltpu.CompilerParams(
                dimension_semantics=dim_sem,
                vmem_limit_bytes=vmem_limit,
            ),
            cost_estimate=cost,
        )

    operands = (x, w1p, b1p, w2p, b2p, w3p, b3p)
    try:
        out_padded = build_call(single_buffer_consts=True)(*operands)
    except Exception:
        # Fallback for jax builds where BlockSpec.pipeline_mode is unsupported:
        # identical kernel, default (double-buffered) grid-invariant operands.
        out_padded = build_call(single_buffer_consts=False)(*operands)

    # TODO(synk): for B << 128 the pallas_call launch overhead dominates; a
    # plain XLA dot chain may be faster in that regime.
    return out_padded[:batch, :out_dim]


# ---------------------------------------------------------------------------
# Reference + init
# ---------------------------------------------------------------------------

def init_params(key, in_dim, hidden_dim, out_dim, dtype=jnp.float32):
    """Deterministic synthetic init (PyTorch-Linear-style uniform bounds)."""
    def linear_init(k, fan_in, fan_out):
        k_w, k_b = jax.random.split(k)
        bound = 1.0 / (fan_in ** 0.5)
        w = jax.random.uniform(k_w, (fan_in, fan_out), dtype, -bound, bound)
        b = jax.random.uniform(k_b, (1, fan_out), dtype, -bound, bound)
        return w, b

    k1, k2, k3 = jax.random.split(key, 3)
    w1, b1 = linear_init(k1, in_dim, hidden_dim)
    w2, b2 = linear_init(k2, hidden_dim, hidden_dim)
    w3, b3 = linear_init(k3, hidden_dim, out_dim)
    return (w1, b1, w2, b2, w3, b3)


def mlp_reference(x_nchw, params, compute_dtype=jnp.float32):
    """Pure-JAX reference with matching operand precision."""
    w1, b1, w2, b2, w3, b3 = params
    x = jnp.reshape(x_nchw, (-1, w1.shape[0]))
    cd = compute_dtype
    h1 = jax.nn.relu(
        jnp.dot(x.astype(cd), w1.astype(cd), preferred_element_type=jnp.float32) + b1)
    h2 = jax.nn.relu(
        jnp.dot(h1.astype(cd), w2.astype(cd), preferred_element_type=jnp.float32) + b2)
    return jnp.dot(h2.astype(cd), w3.astype(cd), preferred_element_type=jnp.float32) + b3


if __name__ == "__main__":
    # Small shapes consistent with the module's forward:
    # in_channel=1, img_sz=16 -> in_dim = 1*16*16 = 256; hidden_dim=32; out_dim=2
    batch, in_channel, img_sz = 2, 1, 16
    hidden_dim, out_dim = 32, 2
    in_dim = in_channel * img_sz * img_sz

    key = jax.random.PRNGKey(0)
    k_x, k_p, k_x2, k_p2 = jax.random.split(key, 4)
    x = jax.random.normal(k_x, (batch, in_channel, img_sz, img_sz), jnp.float32)
    params = init_params(k_p, in_dim, hidden_dim, out_dim)
    prepared = prepare_params(params)  # pad + bf16-cast ONCE (hoisted out of forward)

    out = jax.block_until_ready(mlp_forward(x, prepared))
    assert out.shape == (batch, out_dim)

    # Precision-matched (bf16 operand) reference: tight tolerance.
    ref_bf16 = mlp_reference(x, params, compute_dtype=jnp.bfloat16)
    assert jnp.allclose(out, ref_bf16, atol=1e-3, rtol=1e-3)
    # Full-f32 reference: loose tolerance (bf16 operand rounding).
    ref_f32 = mlp_reference(x, params, compute_dtype=jnp.float32)
    assert jnp.allclose(out, ref_f32, atol=5e-2, rtol=5e-2)

    # Exercise the K-tiled (large-hidden) fallback path on a slightly larger toy
    # shape so the accumulator / pl.when logic is validated end-to-end.
    batch2, hidden2 = 64, 384
    x2 = jax.random.normal(k_x2, (batch2, in_channel, img_sz, img_sz), jnp.float32)
    params2 = init_params(k_p2, in_dim, hidden2, out_dim)
    prepared2 = prepare_params(params2)
    out2 = jax.block_until_ready(
        mlp_forward(x2, prepared2, force_ktiled=True, hid_tile=128))
    assert out2.shape == (batch2, out_dim)
    ref2 = mlp_reference(x2, params2, compute_dtype=jnp.bfloat16)
    assert jnp.allclose(out2, ref2, atol=2e-2, rtol=2e-2)

    print("KERNEL_OK")
</pallas_src>

<mosaic_0001>
module attributes {stable_mosaic.version = 11 : i64} {
  func.func @_mlp_kernel_resident(%arg0: i32, %arg1: memref<8x256xf32, #tpu.memory_space<vmem>>, %arg2: memref<256x128xbf16, #tpu.memory_space<vmem>>, %arg3: memref<1x128xf32, #tpu.memory_space<vmem>>, %arg4: memref<128x128xbf16, #tpu.memory_space<vmem>>, %arg5: memref<1x128xf32, #tpu.memory_space<vmem>>, %arg6: memref<128x128xbf16, #tpu.memory_space<vmem>>, %arg7: memref<1x128xf32, #tpu.memory_space<vmem>>, %arg8: memref<8x128xf32, #tpu.memory_space<vmem>>) attributes {dimension_semantics = [#tpu.dimension_semantics<parallel>], iteration_bounds = array<i64: 1>, scalar_prefetch = 0 : i64, scratch_operands = 0 : i64, tpu.core_type = #tpu.core_type<tc>, window_params = [{transform_indices = @transform_0, window_bounds = array<i64: 8, 256>}, {pipeline_mode = #tpu.pipeline_mode<synchronous>, transform_indices = @transform_1, window_bounds = array<i64: 256, 128>}, {pipeline_mode = #tpu.pipeline_mode<synchronous>, transform_indices = @transform_2, window_bounds = array<i64: 1, 128>}, {pipeline_mode = #tpu.pipeline_mode<synchronous>, transform_indices = @transform_3, window_bounds = array<i64: 128, 128>}, {pipeline_mode = #tpu.pipeline_mode<synchronous>, transform_indices = @transform_4, window_bounds = array<i64: 1, 128>}, {pipeline_mode = #tpu.pipeline_mode<synchronous>, transform_indices = @transform_5, window_bounds = array<i64: 128, 128>}, {pipeline_mode = #tpu.pipeline_mode<synchronous>, transform_indices = @transform_6, window_bounds = array<i64: 1, 128>}, {transform_indices = @transform_7, window_bounds = array<i64: 8, 128>}]} {
    %c0 = arith.constant 0 : index
    %c0_0 = arith.constant 0 : index
    %0 = vector.load %arg1[%c0, %c0_0] : memref<8x256xf32, #tpu.memory_space<vmem>>, vector<8x256xf32>
    %1 = arith.truncf %0 : vector<8x256xf32> to vector<8x256xbf16>
    %c0_1 = arith.constant 0 : index
    %c0_2 = arith.constant 0 : index
    %2 = vector.load %arg2[%c0_1, %c0_2] : memref<256x128xbf16, #tpu.memory_space<vmem>>, vector<256x128xbf16>
    %cst = arith.constant dense<0.000000e+00> : vector<8x128xf32>
    %3 = tpu.matmul %1, %2, %cst {dimension_numbers = #tpu.dot_dimension_numbers<[1], [0], [0], [1], [0, 0, 1, 1], [], []>} : vector<8x256xbf16>, vector<256x128xbf16>, vector<8x128xf32> -> vector<8x128xf32>
    %c0_3 = arith.constant 0 : index
    %c0_4 = arith.constant 0 : index
    %4 = vector.load %arg3[%c0_3, %c0_4] : memref<1x128xf32, #tpu.memory_space<vmem>>, vector<1x128xf32>
    %5 = vector.broadcast %4 : vector<1x128xf32> to vector<8x128xf32>
    %6 = arith.addf %3, %5 : vector<8x128xf32>
    %7 = arith.truncf %6 : vector<8x128xf32> to vector<8x128xbf16>
    %cst_5 = arith.constant 0.000000e+00 : bf16
    %8 = vector.broadcast %cst_5 : bf16 to vector<8x128xbf16>
    %9 = arith.maximumf %7, %8 : vector<8x128xbf16>
    %c0_6 = arith.constant 0 : index
    %c0_7 = arith.constant 0 : index
    %10 = vector.load %arg4[%c0_6, %c0_7] : memref<128x128xbf16, #tpu.memory_space<vmem>>, vector<128x128xbf16>
    %cst_8 = arith.constant dense<0.000000e+00> : vector<8x128xf32>
    %11 = tpu.matmul %9, %10, %cst_8 {dimension_numbers = #tpu.dot_dimension_numbers<[1], [0], [0], [1], [0, 0, 1, 1], [], []>} : vector<8x128xbf16>, vector<128x128xbf16>, vector<8x128xf32> -> vector<8x128xf32>
    %c0_9 = arith.constant 0 : index
    %c0_10 = arith.constant 0 : index
    %12 = vector.load %arg5[%c0_9, %c0_10] : memref<1x128xf32, #tpu.memory_space<vmem>>, vector<1x128xf32>
    %13 = vector.broadcast %12 : vector<1x128xf32> to vector<8x128xf32>
    %14 = arith.addf %11, %13 : vector<8x128xf32>
    %15 = arith.truncf %14 : vector<8x128xf32> to vector<8x128xbf16>
    %cst_11 = arith.constant 0.000000e+00 : bf16
    %16 = vector.broadcast %cst_11 : bf16 to vector<8x128xbf16>
    %17 = arith.maximumf %15, %16 : vector<8x128xbf16>
    %c0_12 = arith.constant 0 : index
    %c0_13 = arith.constant 0 : index
    %18 = vector.load %arg6[%c0_12, %c0_13] : memref<128x128xbf16, #tpu.memory_space<vmem>>, vector<128x128xbf16>
    %cst_14 = arith.constant dense<0.000000e+00> : vector<8x128xf32>
    %19 = tpu.matmul %17, %18, %cst_14 {dimension_numbers = #tpu.dot_dimension_numbers<[1], [0], [0], [1], [0, 0, 1, 1], [], []>} : vector<8x128xbf16>, vector<128x128xbf16>, vector<8x128xf32> -> vector<8x128xf32>
    %c0_15 = arith.constant 0 : index
    %c0_16 = arith.constant 0 : index
    %20 = vector.load %arg7[%c0_15, %c0_16] : memref<1x128xf32, #tpu.memory_space<vmem>>, vector<1x128xf32>
    %21 = vector.broadcast %20 : vector<1x128xf32> to vector<8x128xf32>
    %22 = arith.addf %19, %21 : vector<8x128xf32>
    %c0_17 = arith.constant 0 : index
    %c0_18 = arith.constant 0 : index
    %23 = vector.load %arg8[%c0_17, %c0_18] : memref<8x128xf32, #tpu.memory_space<vmem>>, vector<8x128xf32>
    tpu.vector_store %arg8[%c0_17, %c0_18], %22 {strides = array<i32>} : memref<8x128xf32, #tpu.memory_space<vmem>>, vector<8x128xf32>,
    return
  }
  func.func @transform_0(%arg0: i32) -> (i32, i32) {
    %c0_i32 = arith.constant 0 : i32
    %c0_i32_0 = arith.constant 0 : i32
    return %arg0, %c0_i32 : i32, i32
  }
  func.func @transform_1(%arg0: i32) -> (i32, i32) {
    %c0_i32 = arith.constant 0 : i32
    %c0_i32_0 = arith.constant 0 : i32
    %c0_i32_1 = arith.constant 0 : i32
    return %c0_i32, %c0_i32_0 : i32, i32
  }
  func.func @transform_2(%arg0: i32) -> (i32, i32) {
    %c0_i32 = arith.constant 0 : i32
    %c0_i32_0 = arith.constant 0 : i32
    %c0_i32_1 = arith.constant 0 : i32
    return %c0_i32, %c0_i32_0 : i32, i32
  }
  func.func @transform_3(%arg0: i32) -> (i32, i32) {
    %c0_i32 = arith.constant 0 : i32
    %c0_i32_0 = arith.constant 0 : i32
    %c0_i32_1 = arith.constant 0 : i32
    return %c0_i32, %c0_i32_0 : i32, i32
  }
  func.func @transform_4(%arg0: i32) -> (i32, i32) {
    %c0_i32 = arith.constant 0 : i32
    %c0_i32_0 = arith.constant 0 : i32
    %c0_i32_1 = arith.constant 0 : i32
    return %c0_i32, %c0_i32_0 : i32, i32
  }
  func.func @transform_5(%arg0: i32) -> (i32, i32) {
    %c0_i32 = arith.constant 0 : i32
    %c0_i32_0 = arith.constant 0 : i32
    %c0_i32_1 = arith.constant 0 : i32
    return %c0_i32, %c0_i32_0 : i32, i32
  }
  func.func @transform_6(%arg0: i32) -> (i32, i32) {
    %c0_i32 = arith.constant 0 : i32
    %c0_i32_0 = arith.constant 0 : i32
    %c0_i32_1 = arith.constant 0 : i32
    return %c0_i32, %c0_i32_0 : i32, i32
  }
  func.func @transform_7(%arg0: i32) -> (i32, i32) {
    %c0_i32 = arith.constant 0 : i32
    %c0_i32_0 = arith.constant 0 : i32
    return %arg0, %c0_i32 : i32, i32
  }
}

module attributes {stable_mosaic.version = 11 : i64} {
  func.func @_mlp_kernel_resident(%arg0: i32, %arg1: memref<8x256xf32, #tpu.memory_space<vmem>>, %arg2: memref<256x128xbf16, #tpu.memory_space<vmem>>, %arg3: memref<1x128xf32, #tpu.memory_space<vmem>>, %arg4: memref<128x128xbf16, #tpu.memory_space<vmem>>, %arg5: memref<1x128xf32, #tpu.memory_space<vmem>>, %arg6: memref<128x128xbf16, #tpu.memory_space<vmem>>, %arg7: memref<1x128xf32, #tpu.memory_space<vmem>>, %arg8: memref<8x128xf32, #tpu.memory_space<vmem>>) attributes {dimension_semantics = [#tpu.dimension_semantics<parallel>], iteration_bounds = array<i64: 1>, scalar_prefetch = 0 : i64, scratch_operands = 0 : i64, tpu.core_type = #tpu.core_type<tc>, window_params = [{transform_indices = @transform_0, window_bounds = array<i64: 8, 256>}, {pipeline_mode = #tpu.pipeline_mode<synchronous>, transform_indices = @transform_1, window_bounds = array<i64: 256, 128>}, {pipeline_mode = #tpu.pipeline_mode<synchronous>, transform_indices = @transform_2, window_bounds = array<i64: 1, 128>}, {pipeline_mode = #tpu.pipeline_mode<synchronous>, transform_indices = @transform_3, window_bounds = array<i64: 128, 128>}, {pipeline_mode = #tpu.pipeline_mode<synchronous>, transform_indices = @transform_4, window_bounds = array<i64: 1, 128>}, {pipeline_mode = #tpu.pipeline_mode<synchronous>, transform_indices = @transform_5, window_bounds = array<i64: 128, 128>}, {pipeline_mode = #tpu.pipeline_mode<synchronous>, transform_indices = @transform_6, window_bounds = array<i64: 1, 128>}, {transform_indices = @transform_7, window_bounds = array<i64: 8, 128>}]} {
    %c0 = arith.constant 0 : index
    %c0_0 = arith.constant 0 : index
    %0 = vector.load %arg1[%c0, %c0_0] : memref<8x256xf32, #tpu.memory_space<vmem>>, vector<8x256xf32>
    %1 = arith.truncf %0 : vector<8x256xf32> to vector<8x256xbf16>
    %c0_1 = arith.constant 0 : index
    %c0_2 = arith.constant 0 : index
    %2 = vector.load %arg2[%c0_1, %c0_2] : memref<256x128xbf16, #tpu.memory_space<vmem>>, vector<256x128xbf16>
    %cst = arith.constant dense<0.000000e+00> : vector<8x128xf32>
    %3 = tpu.matmul %1, %2, %cst {dimension_numbers = #tpu.dot_dimension_numbers<[1], [0], [0], [1], [0, 0, 1, 1], [], []>} : vector<8x256xbf16>, vector<256x128xbf16>, vector<8x128xf32> -> vector<8x128xf32>
    %c0_3 = arith.constant 0 : index
    %c0_4 = arith.constant 0 : index
    %4 = vector.load %arg3[%c0_3, %c0_4] : memref<1x128xf32, #tpu.memory_space<vmem>>, vector<1x128xf32>
    %5 = vector.broadcast %4 : vector<1x128xf32> to vector<8x128xf32>
    %6 = arith.addf %3, %5 : vector<8x128xf32>
    %7 = arith.truncf %6 : vector<8x128xf32> to vector<8x128xbf16>
    %cst_5 = arith.constant 0.000000e+00 : bf16
    %8 = vector.broadcast %cst_5 : bf16 to vector<8x128xbf16>
    %9 = arith.maximumf %7, %8 : vector<8x128xbf16>
    %c0_6 = arith.constant 0 : index
    %c0_7 = arith.constant 0 : index
    %10 = vector.load %arg4[%c0_6, %c0_7] : memref<128x128xbf16, #tpu.memory_space<vmem>>, vector<128x128xbf16>
    %cst_8 = arith.constant dense<0.000000e+00> : vector<8x128xf32>
    %11 = tpu.matmul %9, %10, %cst_8 {dimension_numbers = #tpu.dot_dimension_numbers<[1], [0], [0], [1], [0, 0, 1, 1], [], []>} : vector<8x128xbf16>, vector<128x128xbf16>, vector<8x128xf32> -> vector<8x128xf32>
    %c0_9 = arith.constant 0 : index
    %c0_10 = arith.constant 0 : index
    %12 = vector.load %arg5[%c0_9, %c0_10] : memref<1x128xf32, #tpu.memory_space<vmem>>, vector<1x128xf32>
    %13 = vector.broadcast %12 : vector<1x128xf32> to vector<8x128xf32>
    %14 = arith.addf %11, %13 : vector<8x128xf32>
    %15 = arith.truncf %14 : vector<8x128xf32> to vector<8x128xbf16>
    %cst_11 = arith.constant 0.000000e+00 : bf16
    %16 = vector.broadcast %cst_11 : bf16 to vector<8x128xbf16>
    %17 = arith.maximumf %15, %16 : vector<8x128xbf16>
    %c0_12 = arith.constant 0 : index
    %c0_13 = arith.constant 0 : index
    %18 = vector.load %arg6[%c0_12, %c0_13] : memref<128x128xbf16, #tpu.memory_space<vmem>>, vector<128x128xbf16>
    %cst_14 = arith.constant dense<0.000000e+00> : vector<8x128xf32>
    %19 = tpu.matmul %17, %18, %cst_14 {dimension_numbers = #tpu.dot_dimension_numbers<[1], [0], [0], [1], [0, 0, 1, 1], [], []>} : vector<8x128xbf16>, vector<128x128xbf16>, vector<8x128xf32> -> vector<8x128xf32>
    %c0_15 = arith.constant 0 : index
    %c0_16 = arith.constant 0 : index
    %20 = vector.load %arg7[%c0_15, %c0_16] : memref<1x128xf32, #tpu.memory_space<vmem>>, vector<1x128xf32>
    %21 = vector.broadcast %20 : vector<1x128xf32> to vector<8x128xf32>
    %22 = arith.addf %19, %21 : vector<8x128xf32>
    %c0_17 = arith.constant 0 : index
    %c0_18 = arith.constant 0 : index
    %23 = vector.load %arg8[%c0_17, %c0_18] : memref<8x128xf32, #tpu.memory_space<vmem>>, vector<8x128xf32>
    tpu.vector_store %arg8[%c0_17, %c0_18], %22 {strides = array<i32>} : memref<8x128xf32, #tpu.memory_space<vmem>>, vector<8x128xf32>,
    return
  }
  func.func @transform_0(%arg0: i32) -> (i32, i32) {
    %c0_i32 = arith.constant 0 : i32
    %c0_i32_0 = arith.constant 0 : i32
    return %arg0, %c0_i32 : i32, i32
  }
  func.func @transform_1(%arg0: i32) -> (i32, i32) {
    %c0_i32 = arith.constant 0 : i32
    %c0_i32_0 = arith.constant 0 : i32
    %c0_i32_1 = arith.constant 0 : i32
    return %c0_i32, %c0_i32_0 : i32, i32
  }
  func.func @transform_2(%arg0: i32) -> (i32, i32) {
    %c0_i32 = arith.constant 0 : i32
    %c0_i32_0 = arith.constant 0 : i32
    %c0_i32_1 = arith.constant 0 : i32
    return %c0_i32, %c0_i32_0 : i32, i32
  }
  func.func @transform_3(%arg0: i32) -> (i32, i32) {
    %c0_i32 = arith.constant 0 : i32
    %c0_i32_0 = arith.constant 0 : i32
    %c0_i32_1 = arith.constant 0 : i32
    return %c0_i32, %c0_i32_0 : i32, i32
  }
  func.func @transform_4(%arg0: i32) -> (i32, i32) {
    %c0_i32 = arith.constant 0 : i32
    %c0_i32_0 = arith.constant 0 : i32
    %c0_i32_1 = arith.constant 0 : i32
    return %c0_i32, %c0_i32_0 : i32, i32
  }
  func.func @transform_5(%arg0: i32) -> (i32, i32) {
    %c0_i32 = arith.constant 0 : i32
    %c0_i32_0 = arith.constant 0 : i32
    %c0_i32_1 = arith.constant 0 : i32
    return %c0_i32, %c0_i32_0 : i32, i32
  }
  func.func @transform_6(%arg0: i32) -> (i32, i32) {
    %c0_i32 = arith.constant 0 : i32
    %c0_i32_0 = arith.constant 0 : i32
    %c0_i32_1 = arith.constant 0 : i32
    return %c0_i32, %c0_i32_0 : i32, i32
  }
  func.func @transform_7(%arg0: i32) -> (i32, i32) {
    %c0_i32 = arith.constant 0 : i32
    %c0_i32_0 = arith.constant 0 : i32
    return %arg0, %c0_i32 : i32, i32
  }
}

</mosaic_0001>

<bundles_post_ra>
// kernel: tpu_custom_call.1
= control target key start
LH: loop header
LB: loop body
LE: loop exit
PB: predicated region body
PF: predicated region fallthrough
CT: control target
= control target key end

     0   :  { %12 = vsyncpa [#allocation3], 0  ;;  %s809_s0 = inlined_call_operand.hbm [shape: f32[8,256], index: 0, kind: input, shape index: {}]   ;;  %s810_s1 = inlined_call_operand.hbm [shape: bf16[256,128], index: 1, kind: input, shape index: {}]   ;;  %s811_s2 = inlined_call_operand.vmem [shape: f32[1,128], index: 2, kind: input, shape index: {}]   ;;  %s812_s3 = inlined_call_operand.hbm [shape: bf16[128,128], index: 3, kind: input, shape index: {}]   ;;  %s813_s4 = inlined_call_operand.vmem [shape: f32[1,128], index: 4, kind: input, shape index: {}]   ;;  %s814_s5 = inlined_call_operand.hbm [shape: bf16[128,128], index: 5, kind: input, shape index: {}]   ;;  %s815_s6 = inlined_call_operand.vmem [shape: f32[1,128], index: 6, kind: input, shape index: {}]   ;;  %s816_s7 = inlined_call_operand.hbm [shape: f32[8,128], index: 7, kind: output, shape index: {}]  }
   0x1   :  { %13 = vsyncpa [#allocation6], 0 }
   0x2   :  { %14 = vsyncpa [#allocation9], 0  ;;  %s31_s26 = sshll.u32 %s810_s1, 4  ;;  %s32_s26 = int_to_ptr.hbm [resolvable:$true] %s31_s26 }
   0x3   :  { %15 = vsyncpa [#allocation4], 0  ;;  %s738_s27 = smov [#allocation5]   ;;  %s21_s8 = sshll.u32 %s809_s0, 4  ;;  %s22_s8 = int_to_ptr.hbm [resolvable:$true] %s21_s8 }
   0x4   :  { %s33_s28 = sshll.u32 %s738_s27, 4  ;;  %s739_s9 = smov 64   ;;  %s34_s28 = int_to_ptr.vmem [resolvable:$true] %s33_s28 }
   0x5   :  { %s740_s10 = smov 4   ;;  %s741_s11 = smov [#allocation2]  }
   0x6   :  { %39 = dma.hbm_to_vmem [thread:$0]  %s32_s26, 2048, %s34_s28, [#allocation6], %s739_s9, %s739_s9, %s740_s10  }
   0x7   :  { %s23_s12 = sshll.u32 %s741_s11, 4  ;;  %s46_s15 = sshll.u32 %s812_s3, 4  ;;  %s24_s12 = int_to_ptr.vmem [resolvable:$true] %s23_s12  ;;  %s47_s15 = int_to_ptr.hbm [resolvable:$true] %s46_s15 }
   0x8   :  { %26 = dma.hbm_to_vmem [thread:$0]  %s22_s8, 256, %s24_s12, [#allocation3]  }
   0x9   :  { %s61_s17 = sshll.u32 %s814_s5, 4  ;;  %s742_s18 = smov [#allocation7]   ;;  %s62_s17 = int_to_ptr.hbm [resolvable:$true] %s61_s17 }
   0xa   :  { %s48_s19 = sshll.u32 %s742_s18, 4  ;;  %s743_s0 = smov [#allocation8]   ;;  %s49_s19 = int_to_ptr.vmem [resolvable:$true] %s48_s19 }
   0xb   :  { %54 = dma.hbm_to_vmem [thread:$0]  %s47_s15, 1024, %s49_s19, [#allocation6], %s739_s9, %s739_s9, %s740_s10  }
   0xc   :  { %s63_s20 = sshll.u32 %s743_s0, 4  ;;  %s64_s20 = int_to_ptr.vmem [resolvable:$true] %s63_s20 }
   0xd   :  { %69 = dma.hbm_to_vmem [thread:$0]  %s62_s17, 1024, %s64_s20, [#allocation9], %s739_s9, %s739_s9, %s740_s10  }
   0xe   :  { %730 = dma.done.wait [#allocation3], 256  }
   0xf   :  { %731 = vsyncadd [#allocation3], 4294967040 }
  0x10   :  { %732 = dma.done.wait [#allocation6], 3072  }
  0x11   :  { %733 = vsyncadd [#allocation6], 4294964224 }
  0x12   :  { %734 = dma.done.wait [#allocation9], 1024  }
  0x13   :  { %735 = vsyncadd [#allocation9], 4294966272  ;;  %v575_v0 = vld [vmem:[#allocation5 + $0x38] sm:$0xff]  ;;  %v574_v2 = vld [vmem:[#allocation5 + $0x30] sm:$0xff]  ;;  %s744_s24 = smov [#allocation10]   ;;  %s428_s28 = sshll.u32 %s816_s7, 4  ;;  %s429_s28 = int_to_ptr.hbm [resolvable:$true] %s428_s28 }
  0x14   :  { %v583_v1 = vld [vmem:[#allocation5 + $0x78] sm:$0xff]  ;;  %224 = vmatpush.bf16.msra.mxu0 %v575_v0  ;;  %v582_v3 = vld [vmem:[#allocation5 + $0x70] sm:$0xff]  ;;  %v573_v4 = vld [vmem:[#allocation5 + $0x28] sm:$0xff]  ;;  %s426_s25 = sshll.u32 %s744_s24, 4  ;;  %s427_s25 = int_to_ptr.vmem [resolvable:$true] %s426_s25 }
  0x15   :  { %237 = vmatpush.bf16.msra.mxu1 %v583_v1  ;;  %v581_v5 = vld [vmem:[#allocation5 + $0x68] sm:$0xff]  ;;  %v591_v6 = vld [vmem:[#allocation7 + $0x38] sm:$0xff]  ;;  %v590_v7 = vld [vmem:[#allocation7 + $0x30] sm:$0xff] }
  0x16   :  { %322 = vmatpush.bf16.msra.mxu2 %v591_v6  ;;  %v572_v8 = vld [vmem:[#allocation5 + $0x20] sm:$0xff]  ;;  %v589_v10 = vld [vmem:[#allocation7 + $0x28] sm:$0xff]  ;;  %v571_v11 = vld [vmem:[#allocation5 + $0x18] sm:$0xff] }
  0x17   :  { %v580_v9 = vld [vmem:[#allocation5 + $0x60] sm:$0xff]  ;;  %v579_v12 = vld [vmem:[#allocation5 + $0x58] sm:$0xff]  ;;  %v570_v14 = vld [vmem:[#allocation5 + $0x10] sm:$0xff] }
  0x18   :  { %225 = vmatpush.bf16.msra.mxu0 %v574_v2  ;;  %v588_v13 = vld [vmem:[#allocation7 + $0x20] sm:$0xff]  ;;  %v578_v15 = vld [vmem:[#allocation5 + $0x50] sm:$0xff]  ;;  %v587_v16 = vld [vmem:[#allocation7 + $0x18] sm:$0xff] }
  0x19   :  { %238 = vmatpush.bf16.msra.mxu1 %v582_v3  ;;  %v569_v17 = vld [vmem:[#allocation5 + $0x8] sm:$0xff]  ;;  %v586_v19 = vld [vmem:[#allocation7 + $0x10] sm:$0xff]  ;;  %v568_v20 = vld [vmem:[#allocation5] sm:$0xff] }
  0x1a   :  { %323 = vmatpush.bf16.msra.mxu2 %v590_v7  ;;  %v577_v18 = vld [vmem:[#allocation5 + $0x48] sm:$0xff]  ;;  %v576_v21 = vld [vmem:[#allocation5 + $0x40] sm:$0xff]  ;;  %v88_v22 = vld [vmem:[#allocation2] sm:$0xff] }
  0x1b   :  { %v89_v23 = vld [vmem:[#allocation2 + $0x8] sm:$0xff]  ;;  %v90_v24 = vpack.c.bf16 %v88_v22, %v88_v22  ;;  %v585_v26 = vld [vmem:[#allocation7 + $0x8] sm:$0xff]  ;;  %v584_v27 = vld [vmem:[#allocation7] sm:$0xff] }
  0x1c   :  { %226 = vmatpush.bf16.msra.mxu0 %v573_v4  ;;  %v91_v25 = vpack.c.bf16 %v89_v23, %v89_v23  ;;  %v599_v28 = vld [vmem:[#allocation8 + $0x38] sm:$0xff]  ;;  %v598_v29 = vld [vmem:[#allocation8 + $0x30] sm:$0xff]  ;;  %v597_v30 = vld [vmem:[#allocation8 + $0x28] sm:$0xff] }
  0x1d   :  { %239 = vmatpush.bf16.msra.mxu1 %v581_v5  ;;  %407 = vmatpush.bf16.msra.mxu3 %v599_v28  ;;  %v596_v31 = vld [vmem:[#allocation8 + $0x20] sm:$0xff]  ;;  %v595_v32 = vld [vmem:[#allocation8 + $0x18] sm:$0xff]  ;;  %v594_v33 = vld [vmem:[#allocation8 + $0x10] sm:$0xff] }
  0x1e   :  { %324 = vmatpush.bf16.msra.mxu2 %v589_v10  ;;  %v607_v34 = vld [vmem:[%s811_s2] ss:$0 sm:$0xff]  ;;  %v593_v43 = vld [vmem:[#allocation8 + $0x8] sm:$0xff]  ;;  %v592_v44 = vld [vmem:[#allocation8] sm:$0xff] }
  0x1f   :  { %v608_v45 = vld [vmem:[%s813_s4] ss:$0 sm:$0xff] }
  0x20   :  { %227 = vmatpush.bf16.msra.mxu0 %v572_v8  ;;  %v609_v51 = vld [vmem:[%s815_s6] ss:$0 sm:$0xff] }
  0x21   :  { %240 = vmatpush.bf16.msra.mxu1 %v580_v9  ;;  %408 = vmatpush.bf16.msra.mxu3 %v598_v29 }
  0x22   :  { %325 = vmatpush.bf16.msra.mxu2 %v588_v13 }
  0x24   :  { %228 = vmatpush.bf16.msra.mxu0 %v571_v11 }
  0x25   :  { %241 = vmatpush.bf16.msra.mxu1 %v579_v12  ;;  %409 = vmatpush.bf16.msra.mxu3 %v597_v30 }
  0x26   :  { %326 = vmatpush.bf16.msra.mxu2 %v587_v16 }
  0x28   :  { %229 = vmatpush.bf16.msra.mxu0 %v570_v14 }
  0x29   :  { %242 = vmatpush.bf16.msra.mxu1 %v578_v15  ;;  %410 = vmatpush.bf16.msra.mxu3 %v596_v31 }
  0x2a   :  { %327 = vmatpush.bf16.msra.mxu2 %v586_v19 }
  0x2c   :  { %230 = vmatpush.bf16.msra.mxu0 %v569_v17 }
  0x2d   :  { %243 = vmatpush.bf16.msra.mxu1 %v577_v18  ;;  %411 = vmatpush.bf16.msra.mxu3 %v595_v32 }
  0x2e   :  { %328 = vmatpush.bf16.msra.mxu2 %v585_v26 }
  0x30   :  { %231 = vmatpush.bf16.msra.mxu0 %v568_v20 }
  0x31   :  { %244 = vmatpush.bf16.msra.mxu1 %v576_v21  ;;  %412 = vmatpush.bf16.msra.mxu3 %v594_v33 }
  0x32   :  { %329 = vmatpush.bf16.msra.mxu2 %v584_v27 }
  0x33   :  { %232 = vmatmul.bf16.vlgmr.msra.gmra.mxu0 %v90_v24 }
  0x34   :  { %245 = vmatmul.bf16.vlgmr.msra.gmra.mxu1 %v91_v25 }
  0x35   :  { %413 = vmatpush.bf16.msra.mxu3 %v593_v43 }
  0x39   :  { %414 = vmatpush.bf16.msra.mxu3 %v592_v44 }
  0xb0   :  { %v233_v35 = vpop.f32.mrf.mxu0 }
  0xb1   :  { %v246_v36 = vpop.f32.mrf.mxu1  ;;  %v234_v37 = vadd.f32 %v607_v34, %v233_v35 }
  0xb3   :  { %v247_v38 = vadd.f32 %v246_v36, %v234_v37 }
  0xb5   :  { %v252_v39 = vmax.f32 %v247_v38, 0.0 }
  0xb7   :  { %v253_v40 = vpack.c.bf16 %v252_v39, %v252_v39 }
  0xb8   :  { %v235_v41 = vpop.f32.mrf.mxu0 }
  0xb9   :  { %v248_v42 = vpop.f32.mrf.mxu1  ;;  %330 = vmatmul.bf16.vlgmr.msra.gmra.mxu2 %v253_v40 }
 0x13c   :  { %v331_v46 = vpop.f32.mrf.mxu2 }
 0x13d   :  { %v332_v47 = vadd.f32 %v608_v45, %v331_v46 }
 0x13f   :  { %v337_v48 = vmax.f32 %v332_v47, 0.0 }
 0x141   :  { %v338_v49 = vpack.c.bf16 %v337_v48, %v337_v48 }
 0x143   :  { %415 = vmatmul.bf16.vlgmr.msra.gmra.mxu3 %v338_v49 }
 0x144   :  { %v333_v50 = vpop.f32.mrf.mxu2 }
 0x1c6   :  { %v416_v52 = vpop.f32.mrf.mxu3 }
 0x1c7   :  { %v417_v53 = vadd.f32 %v609_v51, %v416_v52 }
 0x1c9   :  { %420 = vst [vmem:[#allocation10] sm:$0xff] %v417_v53 }
 0x1ca   :  { %431 = dma.vmem_to_hbm [thread:$0]  %s427_s25, 128, %s429_s28, [#allocation4]  }
 0x1ce   :  { %v418_v54 = vpop.f32.mrf.mxu3 }
 0x1cf   :  { %736 = dma.done.wait [#allocation4], 128  }
 0x1d0   :  { %737 = vsyncadd [#allocation4], 4294967168 }
 0x1d1   :  { %436 = vsyncpa [#allocation3], 1 }
 0x1d2   :  { %437 = vsyncpa [#allocation6], 1 }
 0x1d3   :  { %438 = vsyncpa [#allocation9], 1 }
 0x1d4   :  { %439 = vsyncpa [#allocation4], 1 }

// kernel: tpu_custom_call.1
= control target key start
LH: loop header
LB: loop body
LE: loop exit
PB: predicated region body
PF: predicated region fallthrough
CT: control target
= control target key end

     0   :  { %12 = vsyncpa [#allocation3], 0  ;;  %s809_s0 = inlined_call_operand.hbm [shape: f32[8,256], index: 0, kind: input, shape index: {}]   ;;  %s810_s1 = inlined_call_operand.hbm [shape: bf16[256,128], index: 1, kind: input, shape index: {}]   ;;  %s811_s2 = inlined_call_operand.vmem [shape: f32[1,128], index: 2, kind: input, shape index: {}]   ;;  %s812_s3 = inlined_call_operand.hbm [shape: bf16[128,128], index: 3, kind: input, shape index: {}]   ;;  %s813_s4 = inlined_call_operand.vmem [shape: f32[1,128], index: 4, kind: input, shape index: {}]   ;;  %s814_s5 = inlined_call_operand.hbm [shape: bf16[128,128], index: 5, kind: input, shape index: {}]   ;;  %s815_s6 = inlined_call_operand.vmem [shape: f32[1,128], index: 6, kind: input, shape index: {}]   ;;  %s816_s7 = inlined_call_operand.hbm [shape: f32[8,128], index: 7, kind: output, shape index: {}]  }
   0x1   :  { %13 = vsyncpa [#allocation6], 0 }
   0x2   :  { %14 = vsyncpa [#allocation9], 0  ;;  %s31_s26 = sshll.u32 %s810_s1, 4  ;;  %s32_s26 = int_to_ptr.hbm [resolvable:$true] %s31_s26 }
   0x3   :  { %15 = vsyncpa [#allocation4], 0  ;;  %s738_s27 = smov [#allocation5]   ;;  %s21_s8 = sshll.u32 %s809_s0, 4  ;;  %s22_s8 = int_to_ptr.hbm [resolvable:$true] %s21_s8 }
   0x4   :  { %s33_s28 = sshll.u32 %s738_s27, 4  ;;  %s739_s9 = smov 64   ;;  %s34_s28 = int_to_ptr.vmem [resolvable:$true] %s33_s28 }
   0x5   :  { %s740_s10 = smov 4   ;;  %s741_s11 = smov [#allocation2]  }
   0x6   :  { %39 = dma.hbm_to_vmem [thread:$0]  %s32_s26, 2048, %s34_s28, [#allocation6], %s739_s9, %s739_s9, %s740_s10  }
   0x7   :  { %s23_s12 = sshll.u32 %s741_s11, 4  ;;  %s46_s15 = sshll.u32 %s812_s3, 4  ;;  %s24_s12 = int_to_ptr.vmem [resolvable:$true] %s23_s12  ;;  %s47_s15 = int_to_ptr.hbm [resolvable:$true] %s46_s15 }
   0x8   :  { %26 = dma.hbm_to_vmem [thread:$0]  %s22_s8, 256, %s24_s12, [#allocation3]  }
   0x9   :  { %s61_s17 = sshll.u32 %s814_s5, 4  ;;  %s742_s18 = smov [#allocation7]   ;;  %s62_s17 = int_to_ptr.hbm [resolvable:$true] %s61_s17 }
   0xa   :  { %s48_s19 = sshll.u32 %s742_s18, 4  ;;  %s743_s0 = smov [#allocation8]   ;;  %s49_s19 = int_to_ptr.vmem [resolvable:$true] %s48_s19 }
   0xb   :  { %54 = dma.hbm_to_vmem [thread:$0]  %s47_s15, 1024, %s49_s19, [#allocation6], %s739_s9, %s739_s9, %s740_s10  }
   0xc   :  { %s63_s20 = sshll.u32 %s743_s0, 4  ;;  %s64_s20 = int_to_ptr.vmem [resolvable:$true] %s63_s20 }
   0xd   :  { %69 = dma.hbm_to_vmem [thread:$0]  %s62_s17, 1024, %s64_s20, [#allocation9], %s739_s9, %s739_s9, %s740_s10  }
   0xe   :  { %730 = dma.done.wait [#allocation3], 256  }
   0xf   :  { %731 = vsyncadd [#allocation3], 4294967040 }
  0x10   :  { %732 = dma.done.wait [#allocation6], 3072  }
  0x11   :  { %733 = vsyncadd [#allocation6], 4294964224 }
  0x12   :  { %734 = dma.done.wait [#allocation9], 1024  }
  0x13   :  { %735 = vsyncadd [#allocation9], 4294966272  ;;  %v575_v0 = vld [vmem:[#allocation5 + $0x38] sm:$0xff]  ;;  %v574_v2 = vld [vmem:[#allocation5 + $0x30] sm:$0xff]  ;;  %s744_s24 = smov [#allocation10]   ;;  %s428_s28 = sshll.u32 %s816_s7, 4  ;;  %s429_s28 = int_to_ptr.hbm [resolvable:$true] %s428_s28 }
  0x14   :  { %v583_v1 = vld [vmem:[#allocation5 + $0x78] sm:$0xff]  ;;  %224 = vmatpush.bf16.msra.mxu0 %v575_v0  ;;  %v582_v3 = vld [vmem:[#allocation5 + $0x70] sm:$0xff]  ;;  %v573_v4 = vld [vmem:[#allocation5 + $0x28] sm:$0xff]  ;;  %s426_s25 = sshll.u32 %s744_s24, 4  ;;  %s427_s25 = int_to_ptr.vmem [resolvable:$true] %s426_s25 }
  0x15   :  { %237 = vmatpush.bf16.msra.mxu1 %v583_v1  ;;  %v581_v5 = vld [vmem:[#allocation5 + $0x68] sm:$0xff]  ;;  %v591_v6 = vld [vmem:[#allocation7 + $0x38] sm:$0xff]  ;;  %v590_v7 = vld [vmem:[#allocation7 + $0x30] sm:$0xff] }
  0x16   :  { %322 = vmatpush.bf16.msra.mxu2 %v591_v6  ;;  %v572_v8 = vld [vmem:[#allocation5 + $0x20] sm:$0xff]  ;;  %v589_v10 = vld [vmem:[#allocation7 + $0x28] sm:$0xff]  ;;  %v571_v11 = vld [vmem:[#allocation5 + $0x18] sm:$0xff] }
  0x17   :  { %v580_v9 = vld [vmem:[#allocation5 + $0x60] sm:$0xff]  ;;  %v579_v12 = vld [vmem:[#allocation5 + $0x58] sm:$0xff]  ;;  %v570_v14 = vld [vmem:[#allocation5 + $0x10] sm:$0xff] }
  0x18   :  { %225 = vmatpush.bf16.msra.mxu0 %v574_v2  ;;  %v588_v13 = vld [vmem:[#allocation7 + $0x20] sm:$0xff]  ;;  %v578_v15 = vld [vmem:[#allocation5 + $0x50] sm:$0xff]  ;;  %v587_v16 = vld [vmem:[#allocation7 + $0x18] sm:$0xff] }
  0x19   :  { %238 = vmatpush.bf16.msra.mxu1 %v582_v3  ;;  %v569_v17 = vld [vmem:[#allocation5 + $0x8] sm:$0xff]  ;;  %v586_v19 = vld [vmem:[#allocation7 + $0x10] sm:$0xff]  ;;  %v568_v20 = vld [vmem:[#allocation5] sm:$0xff] }
  0x1a   :  { %323 = vmatpush.bf16.msra.mxu2 %v590_v7  ;;  %v577_v18 = vld [vmem:[#allocation5 + $0x48] sm:$0xff]  ;;  %v576_v21 = vld [vmem:[#allocation5 + $0x40] sm:$0xff]  ;;  %v88_v22 = vld [vmem:[#allocation2] sm:$0xff] }
  0x1b   :  { %v89_v23 = vld [vmem:[#allocation2 + $0x8] sm:$0xff]  ;;  %v90_v24 = vpack.c.bf16 %v88_v22, %v88_v22  ;;  %v585_v26 = vld [vmem:[#allocation7 + $0x8] sm:$0xff]  ;;  %v584_v27 = vld [vmem:[#allocation7] sm:$0xff] }
  0x1c   :  { %226 = vmatpush.bf16.msra.mxu0 %v573_v4  ;;  %v91_v25 = vpack.c.bf16 %v89_v23, %v89_v23  ;;  %v599_v28 = vld [vmem:[#allocation8 + $0x38] sm:$0xff]  ;;  %v598_v29 = vld [vmem:[#allocation8 + $0x30] sm:$0xff]  ;;  %v597_v30 = vld [vmem:[#allocation8 + $0x28] sm:$0xff] }
  0x1d   :  { %239 = vmatpush.bf16.msra.mxu1 %v581_v5  ;;  %407 = vmatpush.bf16.msra.mxu3 %v599_v28  ;;  %v596_v31 = vld [vmem:[#allocation8 + $0x20] sm:$0xff]  ;;  %v595_v32 = vld [vmem:[#allocation8 + $0x18] sm:$0xff]  ;;  %v594_v33 = vld [vmem:[#allocation8 + $0x10] sm:$0xff] }
  0x1e   :  { %324 = vmatpush.bf16.msra.mxu2 %v589_v10  ;;  %v607_v34 = vld [vmem:[%s811_s2] ss:$0 sm:$0xff]  ;;  %v593_v43 = vld [vmem:[#allocation8 + $0x8] sm:$0xff]  ;;  %v592_v44 = vld [vmem:[#allocation8] sm:$0xff] }
  0x1f   :  { %v608_v45 = vld [vmem:[%s813_s4] ss:$0 sm:$0xff] }
  0x20   :  { %227 = vmatpush.bf16.msra.mxu0 %v572_v8  ;;  %v609_v51 = vld [vmem:[%s815_s6] ss:$0 sm:$0xff] }
  0x21   :  { %240 = vmatpush.bf16.msra.mxu1 %v580_v9  ;;  %408 = vmatpush.bf16.msra.mxu3 %v598_v29 }
  0x22   :  { %325 = vmatpush.bf16.msra.mxu2 %v588_v13 }
  0x24   :  { %228 = vmatpush.bf16.msra.mxu0 %v571_v11 }
  0x25   :  { %241 = vmatpush.bf16.msra.mxu1 %v579_v12  ;;  %409 = vmatpush.bf16.msra.mxu3 %v597_v30 }
  0x26   :  { %326 = vmatpush.bf16.msra.mxu2 %v587_v16 }
  0x28   :  { %229 = vmatpush.bf16.msra.mxu0 %v570_v14 }
  0x29   :  { %242 = vmatpush.bf16.msra.mxu1 %v578_v15  ;;  %410 = vmatpush.bf16.msra.mxu3 %v596_v31 }
  0x2a   :  { %327 = vmatpush.bf16.msra.mxu2 %v586_v19 }
  0x2c   :  { %230 = vmatpush.bf16.msra.mxu0 %v569_v17 }
  0x2d   :  { %243 = vmatpush.bf16.msra.mxu1 %v577_v18  ;;  %411 = vmatpush.bf16.msra.mxu3 %v595_v32 }
  0x2e   :  { %328 = vmatpush.bf16.msra.mxu2 %v585_v26 }
  0x30   :  { %231 = vmatpush.bf16.msra.mxu0 %v568_v20 }
  0x31   :  { %244 = vmatpush.bf16.msra.mxu1 %v576_v21  ;;  %412 = vmatpush.bf16.msra.mxu3 %v594_v33 }
  0x32   :  { %329 = vmatpush.bf16.msra.mxu2 %v584_v27 }
  0x33   :  { %232 = vmatmul.bf16.vlgmr.msra.gmra.mxu0 %v90_v24 }
  0x34   :  { %245 = vmatmul.bf16.vlgmr.msra.gmra.mxu1 %v91_v25 }
  0x35   :  { %413 = vmatpush.bf16.msra.mxu3 %v593_v43 }
  0x39   :  { %414 = vmatpush.bf16.msra.mxu3 %v592_v44 }
  0xb0   :  { %v233_v35 = vpop.f32.mrf.mxu0 }
  0xb1   :  { %v246_v36 = vpop.f32.mrf.mxu1  ;;  %v234_v37 = vadd.f32 %v607_v34, %v233_v35 }
  0xb3   :  { %v247_v38 = vadd.f32 %v246_v36, %v234_v37 }
  0xb5   :  { %v252_v39 = vmax.f32 %v247_v38, 0.0 }
  0xb7   :  { %v253_v40 = vpack.c.bf16 %v252_v39, %v252_v39 }
  0xb8   :  { %v235_v41 = vpop.f32.mrf.mxu0 }
  0xb9   :  { %v248_v42 = vpop.f32.mrf.mxu1  ;;  %330 = vmatmul.bf16.vlgmr.msra.gmra.mxu2 %v253_v40 }
 0x13c   :  { %v331_v46 = vpop.f32.mrf.mxu2 }
 0x13d   :  { %v332_v47 = vadd.f32 %v608_v45, %v331_v46 }
 0x13f   :  { %v337_v48 = vmax.f32 %v332_v47, 0.0 }
 0x141   :  { %v338_v49 = vpack.c.bf16 %v337_v48, %v337_v48 }
 0x143   :  { %415 = vmatmul.bf16.vlgmr.msra.gmra.mxu3 %v338_v49 }
 0x144   :  { %v333_v50 = vpop.f32.mrf.mxu2 }
 0x1c6   :  { %v416_v52 = vpop.f32.mrf.mxu3 }
 0x1c7   :  { %v417_v53 = vadd.f32 %v609_v51, %v416_v52 }
 0x1c9   :  { %420 = vst [vmem:[#allocation10] sm:$0xff] %v417_v53 }
 0x1ca   :  { %431 = dma.vmem_to_hbm [thread:$0]  %s427_s25, 128, %s429_s28, [#allocation4]  }
 0x1ce   :  { %v418_v54 = vpop.f32.mrf.mxu3 }
 0x1cf   :  { %736 = dma.done.wait [#allocation4], 128  }
 0x1d0   :  { %737 = vsyncadd [#allocation4], 4294967168 }
 0x1d1   :  { %436 = vsyncpa [#allocation3], 1 }
 0x1d2   :  { %437 = vsyncpa [#allocation6], 1 }
 0x1d3   :  { %438 = vsyncpa [#allocation9], 1 }
 0x1d4   :  { %439 = vsyncpa [#allocation4], 1 }

</bundles_post_ra>
